<compile_context>
chip_gen: v7x
topology: tpu7x:2x2x1
jax: 0.10.0
libtpu: 0.0.40
codegen_flags: <defaults>
</compile_context>

<pallas_src>
import functools

import jax
import jax.numpy as jnp
from jax import lax
from jax.experimental import pallas as pl
from jax.experimental.pallas import tpu as pltpu


def _cond_entropy_kernel(x_ref, o_ref, *, batch, block_rows, needs_mask):
    i = pl.program_id(0)

    def _partial(mask_rows: bool):
        x = x_ref[...].astype(jnp.float32)                         # (TB, C) f32

        if mask_rows:
            # Rows beyond the true batch (ragged last tile) hold unspecified
            # data: zero them so the softmax statistics stay finite.
            row = i * block_rows + lax.broadcasted_iota(
                jnp.int32, (block_rows, 1), 0)
            valid = row < batch                                    # (TB, 1) bool
            x = jnp.where(valid, x, 0.0)

        # Numerically-stable softmax statistics along the class (lane) axis.
        m = jnp.max(x, axis=1, keepdims=True)                      # (TB, 1)
        z = x - m
        ez = jnp.exp(z)                                            # EUP
        s = jnp.sum(ez, axis=1, keepdims=True)                     # (TB, 1)
        szz = jnp.sum(ez * z, axis=1, keepdims=True)               # (TB, 1)
        # sum_c p * log p = (sum_c e^z * z) / s - log(s)  (since sum_c p == 1).
        # Per-row reciprocal goes to the EUP slot (approx is plenty for a loss).
        b_row = szz * pl.reciprocal(s, approx=True) - jnp.log(s)   # (TB, 1)

        if mask_rows:
            b_row = jnp.where(valid, b_row, 0.0)

        return jnp.sum(b_row, axis=0, keepdims=True)               # (1, 1)

    if needs_mask:
        last = pl.num_programs(0) - 1

        @pl.when(i == last)
        def _():   # only the ragged last tile pays the block-wide selects
            o_ref[...] = _partial(True)

        @pl.when(i != last)
        def _():
            o_ref[...] = _partial(False)
    else:
        o_ref[...] = _partial(False)


def _round_up(n: int, m: int) -> int:
    return ((n + m - 1) // m) * m


def _vmem_capacity_bytes() -> int:
    # Per-generation VMEM (v5e/v6e: 128 MiB, v7x: 64 MiB per TC).
    try:
        cap = int(pltpu.get_tpu_info().vmem_capacity_bytes)
        if cap > 0:
            return cap
    except Exception:
        pass
    return 64 * 1024 * 1024  # conservative fallback (v7x per-core VMEM)


def conditional_entropy_loss(x: jax.Array, *, block_rows: int | None = None) -> jax.Array:
    """x: (B, C) logits (f32 or bf16). Returns scalar float32 loss."""
    B, C = x.shape
    itemsize = jnp.dtype(x.dtype).itemsize
    # Sublane packing: f32 -> 8 rows per vreg, bf16 -> 16, int8/fp8 -> 32.
    pack = max(8, 32 // itemsize)
    c_pad = _round_up(C, 128)  # lane-padded width actually occupying VMEM

    # Per batch-row VMEM cost of one tile step:
    #   2x double-buffered input block + ~4 block-sized f32 temporaries
    #   (x_f32, z, e^z, e^z*z) produced by the in-kernel elementwise chain.
    per_row_bytes = c_pad * (2 * itemsize + 4 * 4)

    vmem_cap = _vmem_capacity_bytes()
    # Spend at most ~half of physical VMEM (and never more than ~48 MiB) on
    # this kernel; diminishing returns past a few MiB of input per block.
    budget = min(max(vmem_cap // 2, 16 * 1024 * 1024), 48 * 1024 * 1024)

    if block_rows is None:
        tb = (budget // per_row_bytes) // pack * pack
        tb = max(pack, tb)
    else:
        tb = max(pack, _round_up(block_rows, pack))
    tb = min(tb, _round_up(B, pack))

    grid = pl.cdiv(B, tb)
    needs_mask = (B % tb) != 0

    # VMEM limit derived from the real footprint (input double-buffer + f32
    # temporaries), not a hardcoded constant; never above physical capacity.
    footprint = tb * per_row_bytes + (1 << 20)
    vmem_limit = int(min(vmem_cap, max(32 * 1024 * 1024, footprint)))

    kernel = functools.partial(
        _cond_entropy_kernel, batch=B, block_rows=tb, needs_mask=needs_mask
    )

    partials = pl.pallas_call(
        kernel,
        out_shape=jax.ShapeDtypeStruct((grid, 1), jnp.float32),
        grid_spec=pltpu.PrefetchScalarGridSpec(
            num_scalar_prefetch=0,
            grid=(grid,),
            in_specs=[pl.BlockSpec((tb, C), lambda i: (i, 0))],
            # One partial sum per tile -> no revisited output block, so the
            # grid axis can be 'parallel' (megacore sharding on v7x).
            out_specs=pl.BlockSpec((1, 1), lambda i: (i, 0)),
        ),
        compiler_params=pltpu.CompilerParams(
            dimension_semantics=("parallel",),
            vmem_limit_bytes=vmem_limit,
        ),
        cost_estimate=pl.CostEstimate(
            flops=5 * B * C,
            transcendentals=B * C,
            bytes_accessed=B * C * itemsize + grid * 4,
        ),
    )(x)

    # Tiny finalize in the wrapper: sum the per-tile partials, mean over the
    # true batch, negate.
    return (-1.0 / B) * jnp.sum(partials)


def conditional_entropy_loss_ref(x: jax.Array) -> jax.Array:
    # Pure-JAX reference matching the PyTorch module exactly (f32 math).
    xf = x.astype(jnp.float32)
    p = jax.nn.softmax(xf, axis=1)
    logp = jax.nn.log_softmax(xf, axis=1)
    b = jnp.sum(p * logp, axis=1)
    return -1.0 * jnp.mean(b, axis=0)


if __name__ == "__main__":
    key = jax.random.PRNGKey(0)
    k1, k2, k3, k4 = jax.random.split(key, 4)

    # Tolerance accommodates the in-kernel EUP approximate reciprocal
    # (per-row 1/s); loss magnitudes here are O(log C) ~ 2-5.
    RTOL = ATOL = 1e-3

    # Case 1: small, tile-aligned, single grid step.
    x1 = jax.random.normal(k1, (8, 128), dtype=jnp.float32)
    loss1 = jax.block_until_ready(conditional_entropy_loss(x1))
    ref1 = jax.block_until_ready(conditional_entropy_loss_ref(x1))
    assert jnp.allclose(loss1, ref1, rtol=RTOL, atol=ATOL), (loss1, ref1)

    # Case 2: batch not divisible by the tile -> multi-step grid, masked last
    # tile, multiple per-tile partial outputs reduced in the wrapper.
    x2 = jax.random.normal(k2, (20, 256), dtype=jnp.float32)
    loss2 = jax.block_until_ready(conditional_entropy_loss(x2, block_rows=8))
    ref2 = jax.block_until_ready(conditional_entropy_loss_ref(x2))
    assert jnp.allclose(loss2, ref2, rtol=RTOL, atol=ATOL), (loss2, ref2)

    # Case 3: bf16 logits (half the HBM traffic), multi-step grid.
    x3 = jax.random.normal(k3, (32, 128), dtype=jnp.bfloat16)
    loss3 = jax.block_until_ready(conditional_entropy_loss(x3, block_rows=16))
    ref3 = jax.block_until_ready(conditional_entropy_loss_ref(x3))
    assert jnp.allclose(loss3, ref3, rtol=RTOL, atol=ATOL), (loss3, ref3)

    # Case 4: tiny class count (C < 128, lane-sparse but correct).
    x4 = jax.random.normal(k4, (16, 10), dtype=jnp.float32)
    loss4 = jax.block_until_ready(conditional_entropy_loss(x4))
    ref4 = jax.block_until_ready(conditional_entropy_loss_ref(x4))
    assert jnp.allclose(loss4, ref4, rtol=RTOL, atol=ATOL), (loss4, ref4)

    print("KERNEL_OK")
</pallas_src>

<mosaic_0001>
module attributes {stable_mosaic.version = 11 : i64} {
  func.func @_cond_entropy_kernel(%arg0: i32, %arg1: memref<8x128xf32, #tpu.memory_space<vmem>>, %arg2: memref<1x1xf32, #tpu.memory_space<vmem>>) attributes {dimension_semantics = [#tpu.dimension_semantics<parallel>], iteration_bounds = array<i64: 1>, scalar_prefetch = 0 : i64, scratch_operands = 0 : i64, tpu.core_type = #tpu.core_type<tc>, window_params = [{transform_indices = @transform_0, window_bounds = array<i64: 8, 128>}, {transform_indices = @transform_1, window_bounds = array<i64: 1, 1>}]} {
    %c0 = arith.constant 0 : index
    %c0_0 = arith.constant 0 : index
    %0 = vector.load %arg1[%c0, %c0_0] : memref<8x128xf32, #tpu.memory_space<vmem>>, vector<8x128xf32>
    %cst = arith.constant dense<0xFF800000> : vector<8xf32>
    %1 = vector.multi_reduction <maximumf>, %0, %cst [1] : vector<8x128xf32> to vector<8xf32>
    %2 = vector.shape_cast %1 : vector<8xf32> to vector<8x1xf32>
    %3 = vector.broadcast %2 : vector<8x1xf32> to vector<8x128xf32>
    %4 = arith.subf %0, %3 : vector<8x128xf32>
    %5 = math.exp %4 : vector<8x128xf32>
    %cst_1 = arith.constant dense<0.000000e+00> : vector<8xf32>
    %6 = vector.multi_reduction <add>, %5, %cst_1 [1] : vector<8x128xf32> to vector<8xf32>
    %7 = vector.shape_cast %6 : vector<8xf32> to vector<8x1xf32>
    %8 = arith.mulf %5, %4 : vector<8x128xf32>
    %cst_2 = arith.constant dense<0.000000e+00> : vector<8xf32>
    %9 = vector.multi_reduction <add>, %8, %cst_2 [1] : vector<8x128xf32> to vector<8xf32>
    %10 = vector.shape_cast %9 : vector<8xf32> to vector<8x1xf32>
    %11 = tpu.reciprocal %7 {approx = true} : vector<8x1xf32> -> vector<8x1xf32>
    %12 = arith.mulf %10, %11 : vector<8x1xf32>
    %13 = math.log %7 : vector<8x1xf32>
    %14 = arith.subf %12, %13 : vector<8x1xf32>
    %cst_3 = arith.constant dense<0.000000e+00> : vector<1xf32>
    %15 = vector.multi_reduction <add>, %14, %cst_3 [0] : vector<8x1xf32> to vector<1xf32>
    %16 = vector.shape_cast %15 : vector<1xf32> to vector<1x1xf32>
    %c0_4 = arith.constant 0 : index
    %c0_5 = arith.constant 0 : index
    %17 = vector.load %arg2[%c0_4, %c0_5] : memref<1x1xf32, #tpu.memory_space<vmem>>, vector<1x1xf32>
    tpu.vector_store %arg2[%c0_4, %c0_5], %16 {strides = array<i32>} : memref<1x1xf32, #tpu.memory_space<vmem>>, vector<1x1xf32>,
    return
  }
  func.func @transform_0(%arg0: i32) -> (i32, i32) {
    %c0_i32 = arith.constant 0 : i32
    %c0_i32_0 = arith.constant 0 : i32
    return %arg0, %c0_i32 : i32, i32
  }
  func.func @transform_1(%arg0: i32) -> (i32, i32) {
    %c0_i32 = arith.constant 0 : i32
    %c0_i32_0 = arith.constant 0 : i32
    return %arg0, %c0_i32 : i32, i32
  }
}

</mosaic_0001>

<bundles_post_ra>
// kernel: tpu_custom_call.1
= control target key start
LH: loop header
LB: loop body
LE: loop exit
PB: predicated region body
PF: predicated region fallthrough
CT: control target
= control target key end

     0   :  { %6 = vsyncpa [#allocation3], 0  ;;  %s152_s0 = inlined_call_operand.hbm [shape: f32[8,128], index: 0, kind: input, shape index: {}]   ;;  %s153_s1 = inlined_call_operand.hbm [shape: f32[1,1], index: 1, kind: output, shape index: {}]  }
   0x1   :  { %7 = vsyncpa [#allocation4], 0  ;;  %s116_s6 = smov [#allocation2]   ;;  %s68_s10 = scalar_lea.hbm %s152_s0, 128 }
   0x2   :  { %s14_s7 = sshll.u32 %s116_s6, 4  ;;  %p69_p0 = scmp.ne.s32.totalorder %s152_s0, %s68_s10  ;;  %s15_s7 = int_to_ptr.vmem [resolvable:$true] %s14_s7 }
   0x3   :  { %p72_p1 = scmp.lt.u32.totalorder %s68_s10, %s152_s0 }
   0x5   :  { %p74_p2 = pnand %p72_p1, %p69_p0 }
   0x7   :  { %77 = shalt.err (!%p74_p2)
}
   0x8   :  { %s78_s15 = scalar_lea.vmem %s15_s7, 128  ;;  %p83_p4 = scmp.lt.s32.totalorder %s15_s7, %s15_s7 }
   0x9   :  { %p79_p3 = scmp.ne.s32.totalorder %s15_s7, %s78_s15  ;;  %p84_p5 = scmp.lt.s32.totalorder %s78_s15, %s78_s15 }
   0xb   :  { %p85_p6 = por %p84_p5, %p83_p4 }
   0xd   :  { %p86_p7 = pnand %p85_p6, %p79_p3 }
   0xf   :  { %89 = shalt.err (!%p86_p7)
}
  0x10   :  { %17 = dma.hbm_to_vmem [thread:$0]  %s152_s0, 128, %s15_s7, [#allocation3]  }
  0x11   :  { %112 = dma.done.wait [#allocation3], 128  }
  0x12   :  { %113 = vsyncadd [#allocation3], 4294967168  ;;  %v21_v0 = vld [vmem:[#allocation2] sm:$0xff]  ;;  %s117_s0 = smov [#allocation5]   ;;  %vm43_vm0 = vcmask 0  }
  0x13   :  { %22 = vmax.xlane.f32.xlu0 %v21_v0  ;;  %s51_s18 = sshll.u32 %s117_s0, 4  ;;  %s52_s18 = int_to_ptr.vmem [resolvable:$true] %s51_s18 }
  0x14   :  { %s90_s19 = scalar_lea.vmem %s52_s18, 16  ;;  %s94_s20 = scalar_lea.vmem %s52_s18, 32 }
  0x15   :  { %p91_p8 = scmp.ne.s32.totalorder %s52_s18, %s90_s19  ;;  %p95_p9 = scmp.lt.s32.totalorder %s52_s18, %s52_s18 }
  0x16   :  { %p96_p10 = scmp.lt.s32.totalorder %s94_s20, %s90_s19 }
  0x18   :  { %p97_p11 = por %p96_p10, %p95_p9 }
  0x1a   :  { %p98_p12 = pnand %p97_p11, %p91_p8 }
  0xa0   :  { %v23_v1 = vpop.xlane.xlu0 %22 }
  0xa1   :  { %v24_v2 = vsub.f32 %v21_v0, %v23_v1 }
  0xa3   :  { %v25_v3 = vmul.f32 1.442695, %v24_v2 }
  0xa5   :  { %62 = vpow2.f32 %v25_v3 }
  0xaf   :  { %v63_v4 = vpop.eup %62 }
  0xb0   :  { %27 = vadd.xlane.f32.xlu0 %v63_v4  ;;  %v29_v5 = vmul.f32 %v63_v4, %v24_v2 }
  0xb2   :  { %30 = vadd.xlane.f32.xlu1 %v29_v5 }
 0x13d   :  { %v28_v6 = vpop.xlane.xlu0 %27 }
 0x13e   :  { %64 = vrcp.f32 %v28_v6 }
 0x13f   :  { %66 = vlog2.f32 %v28_v6  ;;  %v31_v8 = vpop.xlane.xlu1 %30 }
 0x148   :  { %v65_v7 = vpop.eup %64 }
 0x149   :  { %v67_v9 = vpop.eup %66  ;;  %v33_v10 = vmul.f32 %v65_v7, %v31_v8 }
 0x14a   :  { %v35_v11 = vmul.f32 0.6931472, %v67_v9 }
 0x14c   :  { %v36_v12 = vsub.f32 %v33_v10, %v35_v11 }
 0x14e   :  { %v37_v13 = vrot.slane %v36_v12, 4 }
 0x150   :  { %v38_v14 = vadd.f32 %v37_v13, %v36_v12 }
 0x152   :  { %v39_v15 = vrot.slane %v38_v14, 2 }
 0x154   :  { %v40_v16 = vadd.f32 %v39_v15, %v38_v14 }
 0x156   :  { %v41_v17 = vrot.slane %v40_v16, 1 }
 0x158   :  { %v42_v18 = vadd.f32 %v41_v17, %v40_v16 }
 0x15a   :  { %44 = vst.msk [vmem:[#allocation5] sm:$0x1] %vm43_vm0, %v42_v18 }
 0x15b   :  { %101 = shalt.err (!%p98_p12)
}
 0x15c   :  { %s102_s23 = scalar_lea.hbm %s153_s1, 16 }
 0x15d   :  { %p103_p13 = scmp.ne.s32.totalorder %s153_s1, %s102_s23  ;;  %p106_p0 = scmp.lt.u32.totalorder %s102_s23, %s153_s1 }
 0x15f   :  { %p108_p1 = pnand %p106_p0, %p103_p13 }
 0x161   :  { %111 = shalt.err (!%p108_p1)
}
 0x162   :  { %54 = dma.vmem_to_hbm [thread:$0]  %s52_s18, 16, %s153_s1, [#allocation4]  }
 0x163   :  { %114 = dma.done.wait [#allocation4], 16  }
 0x164   :  { %115 = vsyncadd [#allocation4], 4294967280 }
 0x165   :  { %58 = vsyncpa [#allocation3], 1 }
 0x166   :  { %59 = vsyncpa [#allocation4], 1 }

</bundles_post_ra>
